<compile_context>
chip_gen: v6e
topology: v6e:2x2x1
jax: 0.10.0
libtpu: 0.0.40
codegen_flags: <defaults>
</compile_context>

<pallas_src>
import numpy as np
import jax
import jax.numpy as jnp
from jax.experimental import pallas as pl
from jax.experimental.pallas import tpu as pltpu

BN_EPS = 1e-5
NEG_PAD = -1e30  # finite -inf surrogate: safe under x*0, representable in bf16


def round_up(v, m):
    return ((v + m - 1) // m) * m


def build_interp_matrix(n, size):
    """Matrix W (n, size) s.t. theta @ W == F.interpolate(theta[:,None,:], size,
    mode='linear', align_corners=False)[:,0,:]."""
    W = np.zeros((n, size), dtype=np.float32)
    scale = n / size
    for i in range(size):
        src = max((i + 0.5) * scale - 0.5, 0.0)
        i0 = min(int(np.floor(src)), n - 1)
        i1 = min(i0 + 1, n - 1)
        lam = src - i0
        W[i0, i] += (1.0 - lam)
        W[i1, i] += lam
    return W


# --------------------------------- kernel -----------------------------------

def make_kernel(num_layers, K, Lp, wdt):
    def kernel(*refs):
        x_ref = refs[0]
        w_refs = refs[1:1 + num_layers]
        whead_ref = refs[1 + num_layers]
        bias_ref = refs[2 + num_layers]
        wi_ref = refs[3 + num_layers]
        e_ref = refs[4 + num_layers]
        res_ref = refs[5 + num_layers]
        fc_ref = refs[6 + num_layers]
        rpad_ref = refs[7 + num_layers]
        fc_acc_ref = refs[8 + num_layers]

        blk = pl.program_id(1)

        @pl.when(blk == 0)
        def _init():
            # Host already laid x out as the padded pooling input:
            # cols [0,L)=x, cols [L,Wpad)=NEG_PAD.  One dense, lane-aligned store.
            rpad_ref[...] = x_ref[...]
            fc_acc_ref[...] = jnp.zeros_like(fc_acc_ref)

        q = rpad_ref[...].astype(wdt)                            # (TB, Wpad), MXU dtype

        # MaxPool1d(K, stride=K, padding=K//2) as K selection matmuls + (K-1) maxima.
        # TODO(synk): for very long input_len this trades O(TB*Wpad*P*K) MXU MACs for
        # MLP slack; switch to strided VPU reads if profiling shows the MXU saturating.
        h = jnp.dot(q, e_ref[0], preferred_element_type=jnp.float32)   # (TB, Pp)
        for k in range(1, K):
            h = jnp.maximum(h, jnp.dot(q, e_ref[k], preferred_element_type=jnp.float32))

        biases = bias_ref[blk]                                   # (num_layers+1, Dmax) f32

        # Leading MLP: Linear -> ReLU (eval BatchNorm folded into the next Linear,
        # Dropout = identity in eval mode).
        for l in range(num_layers):
            w = w_refs[l][blk]                                   # (d_in_p, d_out_p) wdt
            d_out = w.shape[1]
            h = jnp.dot(h.astype(wdt), w, preferred_element_type=jnp.float32) \
                + biases[l:l + 1, :d_out]
            h = jnp.maximum(h, 0.0)

        # Fused backcast|forecast head + fused block-diagonal interpolation:
        # one (TB, Lp + Lout_p) lane-dense result slab.
        wh = whead_ref[blk]                                      # (d_last_p, n_bf_p)
        n_bf_p = wh.shape[1]
        theta = jnp.dot(h.astype(wdt), wh, preferred_element_type=jnp.float32) \
            + biases[num_layers:num_layers + 1, :n_bf_p]
        bf = jnp.dot(theta.astype(wdt), wi_ref[...],
                     preferred_element_type=jnp.float32)         # (TB, Lp + Lout_p)

        rpad_ref[:, pl.ds(0, Lp)] = rpad_ref[:, pl.ds(0, Lp)] - bf[:, :Lp]
        fc_acc_ref[...] = fc_acc_ref[...] + bf[:, Lp:]

        @pl.when(blk == pl.num_programs(1) - 1)
        def _finalize():
            res_ref[...] = rpad_ref[:, pl.ds(0, Lp)]
            fc_ref[...] = fc_acc_ref[...]

    return kernel


# --------------------------------- wrapper ----------------------------------

def nhits_stack(x, params, *, output_len, pool_kernel_dim):
    W_list = params['W_list']
    W_head = params['W_head']
    bias_pack = params['bias_pack']
    Wi = params['Wi']
    E = params['E']

    B, L = x.shape
    K = pool_kernel_dim
    num_layers = len(W_list)
    block_num = W_head.shape[0]
    Wpad = E.shape[1]
    Lp = round_up(L, 128)
    Lout_p = round_up(output_len, 128)
    assert Wi.shape[1] == Lp + Lout_p
    wdt = W_list[0].dtype

    # Batch tiling: 128-row tiles saturate MXU rows on all generations (and give
    # v7x megacore >=2 tiles to shard when B > 128); pad B on the host so there
    # is never a ragged tail / full-batch fallback tile.
    if B <= 128:
        TB, Bp = B, B
    else:
        TB, Bp = 128, round_up(B, 128)
    nbt = Bp // TB

    # Host-padded pooling input: cols [L,Wpad)=NEG_PAD, padded batch rows = 0.
    xp = jnp.full((Bp, Wpad), NEG_PAD, jnp.float32)
    xp = xp.at[:, :L].set(0.0)
    xp = xp.at[:B, :L].set(x.astype(jnp.float32))

    kernel = make_kernel(num_layers, K, Lp, wdt)

    in_specs = [pl.BlockSpec((TB, Wpad), lambda bt, blk: (bt, 0))]
    inputs = [xp]
    # Per-block weights are grid-resident (constant index maps -> fetched once);
    # block selection happens inside the kernel via pl.program_id(1).
    for W in list(W_list) + [W_head, bias_pack]:
        in_specs.append(pl.BlockSpec(W.shape, lambda bt, blk: (0, 0, 0)))
        inputs.append(W)
    in_specs.append(pl.BlockSpec(Wi.shape, lambda bt, blk: (0, 0)))
    inputs.append(Wi)
    in_specs.append(pl.BlockSpec(E.shape, lambda bt, blk: (0, 0, 0)))
    inputs.append(E)

    out_shape = (jax.ShapeDtypeStruct((Bp, Lp), jnp.float32),
                 jax.ShapeDtypeStruct((Bp, Lout_p), jnp.float32))
    out_specs = (pl.BlockSpec((TB, Lp), lambda bt, blk: (bt, 0)),
                 pl.BlockSpec((TB, Lout_p), lambda bt, blk: (bt, 0)))

    # Rough VMEM budget: constants are still double-buffered by default, plus the
    # streamed x/output tiles and the two carry scratch buffers.
    weight_bytes = sum(int(a.size) * a.dtype.itemsize for a in inputs[1:])
    stream_bytes = 2 * 4 * (TB * Wpad + TB * Lp + TB * Lout_p)
    scratch_bytes = 4 * (TB * Wpad + TB * Lout_p)
    est = 2 * weight_bytes + stream_bytes + scratch_bytes
    vmem_limit = int(min(max(est * 5 // 4 + (4 << 20), 16 << 20), 64 << 20))

    res_p, fc_p = pl.pallas_call(
        kernel,
        out_shape=out_shape,
        grid_spec=pltpu.PrefetchScalarGridSpec(
            num_scalar_prefetch=0,
            grid=(nbt, block_num),
            in_specs=in_specs,
            out_specs=out_specs,
            scratch_shapes=[
                pltpu.VMEM((TB, Wpad), jnp.float32),    # padded-residual carry
                pltpu.VMEM((TB, Lout_p), jnp.float32),  # forecast accumulator
            ],
        ),
        compiler_params=pltpu.CompilerParams(
            dimension_semantics=("parallel", "arbitrary"),
            vmem_limit_bytes=vmem_limit),
    )(*inputs)

    return res_p[:B, :L], fc_p[:B, :output_len]


# ----------------------------- host-side params -----------------------------

def init_raw_params(key, block_num, L, L_out, hidden_dims, K, downsample_factor):
    """Torch-like raw parameters (un-folded), stacked over blocks."""
    pad = K // 2
    P = (L + 2 * pad - K) // K + 1
    assert P == int(np.ceil(L / K + 1)), "torch module requires pooled length == ceil(L/K + 1)"
    dims = [P] + list(hidden_dims)
    n_back = int(max(L // downsample_factor, 1))
    n_fore = int(max(L_out // downsample_factor, 1))
    keys = iter(jax.random.split(key, 6 * len(hidden_dims) + 4))

    layers = []
    for i in range(1, len(dims)):
        d_in, d_out = dims[i - 1], dims[i]
        bound = 1.0 / np.sqrt(d_in)
        layers.append(dict(
            W=jax.random.uniform(next(keys), (block_num, d_in, d_out), jnp.float32, -bound, bound),
            b=jax.random.uniform(next(keys), (block_num, d_out), jnp.float32, -bound, bound),
            gamma=jax.random.uniform(next(keys), (block_num, d_out), jnp.float32, 0.5, 1.5),
            beta=0.1 * jax.random.normal(next(keys), (block_num, d_out), jnp.float32),
            mean=0.1 * jax.random.normal(next(keys), (block_num, d_out), jnp.float32),
            var=jax.random.uniform(next(keys), (block_num, d_out), jnp.float32, 0.5, 1.5),
        ))
    d_last = dims[-1]
    bound = 1.0 / np.sqrt(d_last)
    Wb = jax.random.uniform(next(keys), (block_num, d_last, n_back), jnp.float32, -bound, bound)
    bb = jax.random.uniform(next(keys), (block_num, n_back), jnp.float32, -bound, bound)
    Wf = jax.random.uniform(next(keys), (block_num, d_last, n_fore), jnp.float32, -bound, bound)
    bf = jax.random.uniform(next(keys), (block_num, n_fore), jnp.float32, -bound, bound)
    return layers, Wb, bb, Wf, bf


def prepare_kernel_params(layers, Wb, bb, Wf, bf, L, L_out, K, weight_dtype):
    """BN fold, 128-padding, fused heads, bias packing, pooling & interp matrices."""
    pad = K // 2
    P = (L + 2 * pad - K) // K + 1
    block_num = Wb.shape[0]
    num_layers = len(layers)
    n_back, n_fore = Wb.shape[2], Wf.shape[2]

    Lp = round_up(L, 128)
    Lout_p = round_up(L_out, 128)
    Wpad = round_up(L + 1, 128)       # column L is the dedicated NEG_PAD column
    Pp = round_up(P, 128)
    n_bf_p = round_up(n_back + n_fore, 128)

    # Eval-mode BatchNorm (after ReLU) folded into the *next* Linear.
    scales = [ly['gamma'] / jnp.sqrt(ly['var'] + BN_EPS) for ly in layers]
    shifts = [ly['beta'] - ly['mean'] * s for ly, s in zip(layers, scales)]

    W_raw, b_raw = [layers[0]['W']], [layers[0]['b']]
    for l in range(1, num_layers):
        W, b = layers[l]['W'], layers[l]['b']
        W_raw.append(scales[l - 1][:, :, None] * W)
        b_raw.append(jnp.einsum('bi,bio->bo', shifts[l - 1], W) + b)
    Wb_f = scales[-1][:, :, None] * Wb
    bb_f = jnp.einsum('bi,bio->bo', shifts[-1], Wb) + bb
    Wf_f = scales[-1][:, :, None] * Wf
    bf_f = jnp.einsum('bi,bio->bo', shifts[-1], Wf) + bf

    # Zero-pad all feature dims to multiples of 128 (lane-dense MXU tiles).
    dims = [P] + [W.shape[2] for W in W_raw]
    dims_p = [Pp] + [round_up(d, 128) for d in dims[1:]]

    def pad3(W, d_in_p, d_out_p):
        out = jnp.zeros((block_num, d_in_p, d_out_p), jnp.float32)
        return out.at[:, :W.shape[1], :W.shape[2]].set(W)

    W_list = [pad3(W_raw[l], dims_p[l], dims_p[l + 1]) for l in range(num_layers)]

    # Fused backcast|forecast head: cols [0,n_back)=backcast, [n_back,n_back+n_fore)=forecast.
    W_head = jnp.zeros((block_num, dims_p[-1], n_bf_p), jnp.float32)
    W_head = W_head.at[:, :dims[-1], :n_back].set(Wb_f)
    W_head = W_head.at[:, :dims[-1], n_back:n_back + n_fore].set(Wf_f)

    # Bias packing: one (block_num, num_layers+1, Dmax) f32 array (single resident DMA).
    Dmax = max(dims_p[1:] + [n_bf_p])
    bias_pack = jnp.zeros((block_num, num_layers + 1, Dmax), jnp.float32)
    for l in range(num_layers):
        bias_pack = bias_pack.at[:, l, :dims[l + 1]].set(b_raw[l])
    bias_pack = bias_pack.at[:, num_layers, :n_back].set(bb_f)
    bias_pack = bias_pack.at[:, num_layers, n_back:n_back + n_fore].set(bf_f)

    # MaxPool selection matrices: E[k,i,p]=1 picks padded-residual column i for
    # output window p, tap k; out-of-range taps point at the NEG_PAD column L.
    # NOTE: data more negative than NEG_PAD (-1e30) would diverge from torch -inf padding.
    E = np.zeros((K, Wpad, Pp), np.float32)
    for p in range(P):
        for k in range(K):
            i = p * K + k - pad
            if 0 <= i < L:
                E[k, i, p] = 1.0
            else:
                E[k, L, p] = 1.0

    # Fused block-diagonal interpolation matrix (backcast cols [0,L), forecast cols [Lp,Lp+L_out)).
    Wi = np.zeros((n_bf_p, Lp + Lout_p), np.float32)
    Wi[:n_back, :L] = build_interp_matrix(n_back, L)
    Wi[n_back:n_back + n_fore, Lp:Lp + L_out] = build_interp_matrix(n_fore, L_out)

    wd = weight_dtype
    return dict(
        W_list=tuple(W.astype(wd) for W in W_list),
        W_head=W_head.astype(wd),
        bias_pack=bias_pack,                 # stays f32 (added after f32 accumulation)
        Wi=jnp.asarray(Wi).astype(wd),
        E=jnp.asarray(E).astype(wd),         # weight dtype -> bf16 MXU rate + half VMEM
    )


# ------------------------------- pure-JAX ref --------------------------------

def reference(x, layers, Wb, bb, Wf, bf, wi_b, wi_f, K):
    """Original (un-folded) NhitsStack forward, eval mode, f32."""
    pad = K // 2
    B, L = x.shape
    P = (L + 2 * pad - K) // K + 1
    block_num = Wb.shape[0]
    L_out = wi_f.shape[1]
    residual = x
    forecast = jnp.zeros((B, L_out), jnp.float32)
    for blk in range(block_num):
        padded = jnp.concatenate(
            [jnp.full((B, pad), -jnp.inf, x.dtype), residual,
             jnp.full((B, pad), -jnp.inf, x.dtype)], axis=1)
        h = jnp.max(padded[:, :P * K].reshape(B, P, K), axis=-1)
        for ly in layers:
            h = jnp.maximum(h @ ly['W'][blk] + ly['b'][blk], 0.0)
            h = (h - ly['mean'][blk]) / jnp.sqrt(ly['var'][blk] + BN_EPS) \
                * ly['gamma'][blk] + ly['beta'][blk]
        theta_b = h @ Wb[blk] + bb[blk]
        theta_f = h @ Wf[blk] + bf[blk]
        residual = residual - theta_b @ wi_b
        forecast = forecast + theta_f @ wi_f
    return residual, forecast


if __name__ == "__main__":
    B = 8
    input_len = 16
    output_len = 16
    block_num = 3
    hidden_dims = [32, 24]
    pool_kernel_dim = 4
    downsample_factor = 4

    key = jax.random.PRNGKey(0)
    kx, kp = jax.random.split(key)
    x = jax.random.normal(kx, (B, input_len), jnp.float32)
    layers, Wb, bb, Wf, bf = init_raw_params(
        kp, block_num, input_len, output_len, hidden_dims, pool_kernel_dim,
        downsample_factor)

    n_back = max(input_len // downsample_factor, 1)
    n_fore = max(output_len // downsample_factor, 1)
    wi_b = jnp.asarray(build_interp_matrix(n_back, input_len))
    wi_f = jnp.asarray(build_interp_matrix(n_fore, output_len))
    ref_res, ref_fc = reference(x, layers, Wb, bb, Wf, bf, wi_b, wi_f, pool_kernel_dim)

    # f32 weights: checks BN fold / 128-padding / pooling-gather / fused-head plumbing.
    p32 = prepare_kernel_params(layers, Wb, bb, Wf, bf, input_len, output_len,
                                pool_kernel_dim, jnp.float32)
    res32, fc32 = nhits_stack(x, p32, output_len=output_len,
                              pool_kernel_dim=pool_kernel_dim)
    jax.block_until_ready((res32, fc32))
    np.testing.assert_allclose(np.asarray(res32), np.asarray(ref_res), rtol=2e-2, atol=2e-2)
    np.testing.assert_allclose(np.asarray(fc32), np.asarray(ref_fc), rtol=2e-2, atol=2e-2)

    # bf16 weights (MXU-native production config); loose tolerance for bf16 rounding.
    pbf = prepare_kernel_params(layers, Wb, bb, Wf, bf, input_len, output_len,
                                pool_kernel_dim, jnp.bfloat16)
    res16, fc16 = nhits_stack(x, pbf, output_len=output_len,
                              pool_kernel_dim=pool_kernel_dim)
    jax.block_until_ready((res16, fc16))
    np.testing.assert_allclose(np.asarray(res16), np.asarray(ref_res), rtol=2e-1, atol=2e-1)
    np.testing.assert_allclose(np.asarray(fc16), np.asarray(ref_fc), rtol=2e-1, atol=2e-1)

    print("KERNEL_OK")
</pallas_src>

<mosaic_0001>
module attributes {stable_mosaic.version = 11 : i64} {
  func.func @kernel(%arg0: i32, %arg1: i32, %arg2: memref<8x128xf32, #tpu.memory_space<vmem>>, %arg3: memref<3x128x128xf32, #tpu.memory_space<vmem>>, %arg4: memref<3x128x128xf32, #tpu.memory_space<vmem>>, %arg5: memref<3x128x128xf32, #tpu.memory_space<vmem>>, %arg6: memref<3x3x128xf32, #tpu.memory_space<vmem>>, %arg7: memref<128x256xf32, #tpu.memory_space<vmem>>, %arg8: memref<4x128x128xf32, #tpu.memory_space<vmem>>, %arg9: memref<8x128xf32, #tpu.memory_space<vmem>>, %arg10: memref<8x128xf32, #tpu.memory_space<vmem>>, %arg11: memref<8x128xf32, #tpu.memory_space<vmem>>, %arg12: memref<8x128xf32, #tpu.memory_space<vmem>>) attributes {dimension_semantics = [#tpu.dimension_semantics<parallel>, #tpu.dimension_semantics<arbitrary>], iteration_bounds = array<i64: 1, 3>, scalar_prefetch = 0 : i64, scratch_operands = 2 : i64, tpu.core_type = #tpu.core_type<tc>, window_params = [{transform_indices = @transform_0, window_bounds = array<i64: 8, 128>}, {pipeline_mode = #tpu.pipeline_mode<synchronous>, transform_indices = @transform_1, window_bounds = array<i64: 3, 128, 128>}, {pipeline_mode = #tpu.pipeline_mode<synchronous>, transform_indices = @transform_2, window_bounds = array<i64: 3, 128, 128>}, {pipeline_mode = #tpu.pipeline_mode<synchronous>, transform_indices = @transform_3, window_bounds = array<i64: 3, 128, 128>}, {pipeline_mode = #tpu.pipeline_mode<synchronous>, transform_indices = @transform_4, window_bounds = array<i64: 3, 3, 128>}, {pipeline_mode = #tpu.pipeline_mode<synchronous>, transform_indices = @transform_5, window_bounds = array<i64: 128, 256>}, {pipeline_mode = #tpu.pipeline_mode<synchronous>, transform_indices = @transform_6, window_bounds = array<i64: 4, 128, 128>}, {transform_indices = @transform_7, window_bounds = array<i64: 8, 128>}, {transform_indices = @transform_8, window_bounds = array<i64: 8, 128>}]} {
    %c0_i32 = arith.constant 0 : i32
    %0 = arith.cmpi eq, %arg1, %c0_i32 : i32
    %1 = arith.extui %0 : i1 to i32
    %c0_i32_0 = arith.constant 0 : i32
    %2 = arith.cmpi ne, %1, %c0_i32_0 : i32
    scf.if %2 {
      %c0_39 = arith.constant 0 : index
      %c0_40 = arith.constant 0 : index
      %60 = vector.load %arg2[%c0_39, %c0_40] : memref<8x128xf32, #tpu.memory_space<vmem>>, vector<8x128xf32>
      %c0_41 = arith.constant 0 : index
      %c0_42 = arith.constant 0 : index
      %61 = vector.load %arg11[%c0_41, %c0_42] : memref<8x128xf32, #tpu.memory_space<vmem>>, vector<8x128xf32>
      tpu.vector_store %arg11[%c0_41, %c0_42], %60 {strides = array<i32>} : memref<8x128xf32, #tpu.memory_space<vmem>>, vector<8x128xf32>,
      %cst_43 = arith.constant 0.000000e+00 : f32
      %62 = vector.broadcast %cst_43 : f32 to vector<8x128xf32>
      %c0_44 = arith.constant 0 : index
      %c0_45 = arith.constant 0 : index
      %63 = vector.load %arg12[%c0_44, %c0_45] : memref<8x128xf32, #tpu.memory_space<vmem>>, vector<8x128xf32>
      tpu.vector_store %arg12[%c0_44, %c0_45], %62 {strides = array<i32>} : memref<8x128xf32, #tpu.memory_space<vmem>>, vector<8x128xf32>,
    } else {
    }
    %c0 = arith.constant 0 : index
    %c0_1 = arith.constant 0 : index
    %3 = vector.load %arg11[%c0, %c0_1] : memref<8x128xf32, #tpu.memory_space<vmem>>, vector<8x128xf32>
    %c0_2 = arith.constant 0 : index
    %c0_3 = arith.constant 0 : index
    %c0_4 = arith.constant 0 : index
    %4 = vector.load %arg8[%c0_2, %c0_3, %c0_4] : memref<4x128x128xf32, #tpu.memory_space<vmem>>, vector<1x128x128xf32>
    %5 = vector.shape_cast %4 : vector<1x128x128xf32> to vector<128x128xf32>
    %cst = arith.constant dense<0.000000e+00> : vector<8x128xf32>
    %6 = tpu.matmul %3, %5, %cst {dimension_numbers = #tpu.dot_dimension_numbers<[1], [0], [0], [1], [0, 0, 1, 1], [], []>} : vector<8x128xf32>, vector<128x128xf32>, vector<8x128xf32> -> vector<8x128xf32>
    %c1 = arith.constant 1 : index
    %c0_5 = arith.constant 0 : index
    %c0_6 = arith.constant 0 : index
    %7 = vector.load %arg8[%c1, %c0_5, %c0_6] : memref<4x128x128xf32, #tpu.memory_space<vmem>>, vector<1x128x128xf32>
    %8 = vector.shape_cast %7 : vector<1x128x128xf32> to vector<128x128xf32>
    %cst_7 = arith.constant dense<0.000000e+00> : vector<8x128xf32>
    %9 = tpu.matmul %3, %8, %cst_7 {dimension_numbers = #tpu.dot_dimension_numbers<[1], [0], [0], [1], [0, 0, 1, 1], [], []>} : vector<8x128xf32>, vector<128x128xf32>, vector<8x128xf32> -> vector<8x128xf32>
    %10 = arith.maximumf %6, %9 : vector<8x128xf32>
    %c2 = arith.constant 2 : index
    %c0_8 = arith.constant 0 : index
    %c0_9 = arith.constant 0 : index
    %11 = vector.load %arg8[%c2, %c0_8, %c0_9] : memref<4x128x128xf32, #tpu.memory_space<vmem>>, vector<1x128x128xf32>
    %12 = vector.shape_cast %11 : vector<1x128x128xf32> to vector<128x128xf32>
    %cst_10 = arith.constant dense<0.000000e+00> : vector<8x128xf32>
    %13 = tpu.matmul %3, %12, %cst_10 {dimension_numbers = #tpu.dot_dimension_numbers<[1], [0], [0], [1], [0, 0, 1, 1], [], []>} : vector<8x128xf32>, vector<128x128xf32>, vector<8x128xf32> -> vector<8x128xf32>
    %14 = arith.maximumf %10, %13 : vector<8x128xf32>
    %c3 = arith.constant 3 : index
    %c0_11 = arith.constant 0 : index
    %c0_12 = arith.constant 0 : index
    %15 = vector.load %arg8[%c3, %c0_11, %c0_12] : memref<4x128x128xf32, #tpu.memory_space<vmem>>, vector<1x128x128xf32>
    %16 = vector.shape_cast %15 : vector<1x128x128xf32> to vector<128x128xf32>
    %cst_13 = arith.constant dense<0.000000e+00> : vector<8x128xf32>
    %17 = tpu.matmul %3, %16, %cst_13 {dimension_numbers = #tpu.dot_dimension_numbers<[1], [0], [0], [1], [0, 0, 1, 1], [], []>} : vector<8x128xf32>, vector<128x128xf32>, vector<8x128xf32> -> vector<8x128xf32>
    %18 = arith.maximumf %14, %17 : vector<8x128xf32>
    %19 = arith.index_cast %arg1 : i32 to index
    %c0_14 = arith.constant 0 : index
    %c0_15 = arith.constant 0 : index
    %20 = vector.load %arg6[%19, %c0_14, %c0_15] : memref<3x3x128xf32, #tpu.memory_space<vmem>>, vector<1x3x128xf32>
    %21 = vector.shape_cast %20 : vector<1x3x128xf32> to vector<3x128xf32>
    %22 = arith.index_cast %arg1 : i32 to index
    %c0_16 = arith.constant 0 : index
    %c0_17 = arith.constant 0 : index
    %23 = vector.load %arg3[%22, %c0_16, %c0_17] : memref<3x128x128xf32, #tpu.memory_space<vmem>>, vector<1x128x128xf32>
    %24 = vector.shape_cast %23 : vector<1x128x128xf32> to vector<128x128xf32>
    %cst_18 = arith.constant dense<0.000000e+00> : vector<8x128xf32>
    %25 = tpu.matmul %18, %24, %cst_18 {dimension_numbers = #tpu.dot_dimension_numbers<[1], [0], [0], [1], [0, 0, 1, 1], [], []>} : vector<8x128xf32>, vector<128x128xf32>, vector<8x128xf32> -> vector<8x128xf32>
    %26 = vector.extract_strided_slice %21 {offsets = [0, 0], sizes = [1, 128], strides = [1, 1]} : vector<3x128xf32> to vector<1x128xf32>
    %27 = vector.broadcast %26 : vector<1x128xf32> to vector<8x128xf32>
    %28 = arith.addf %25, %27 : vector<8x128xf32>
    %cst_19 = arith.constant 0.000000e+00 : f32
    %29 = vector.broadcast %cst_19 : f32 to vector<8x128xf32>
    %30 = arith.maximumf %28, %29 : vector<8x128xf32>
    %31 = arith.index_cast %arg1 : i32 to index
    %c0_20 = arith.constant 0 : index
    %c0_21 = arith.constant 0 : index
    %32 = vector.load %arg4[%31, %c0_20, %c0_21] : memref<3x128x128xf32, #tpu.memory_space<vmem>>, vector<1x128x128xf32>
    %33 = vector.shape_cast %32 : vector<1x128x128xf32> to vector<128x128xf32>
    %cst_22 = arith.constant dense<0.000000e+00> : vector<8x128xf32>
    %34 = tpu.matmul %30, %33, %cst_22 {dimension_numbers = #tpu.dot_dimension_numbers<[1], [0], [0], [1], [0, 0, 1, 1], [], []>} : vector<8x128xf32>, vector<128x128xf32>, vector<8x128xf32> -> vector<8x128xf32>
    %35 = vector.extract_strided_slice %21 {offsets = [1, 0], sizes = [1, 128], strides = [1, 1]} : vector<3x128xf32> to vector<1x128xf32>
    %36 = vector.broadcast %35 : vector<1x128xf32> to vector<8x128xf32>
    %37 = arith.addf %34, %36 : vector<8x128xf32>
    %cst_23 = arith.constant 0.000000e+00 : f32
    %38 = vector.broadcast %cst_23 : f32 to vector<8x128xf32>
    %39 = arith.maximumf %37, %38 : vector<8x128xf32>
    %40 = arith.index_cast %arg1 : i32 to index
    %c0_24 = arith.constant 0 : index
    %c0_25 = arith.constant 0 : index
    %41 = vector.load %arg5[%40, %c0_24, %c0_25] : memref<3x128x128xf32, #tpu.memory_space<vmem>>, vector<1x128x128xf32>
    %42 = vector.shape_cast %41 : vector<1x128x128xf32> to vector<128x128xf32>
    %cst_26 = arith.constant dense<0.000000e+00> : vector<8x128xf32>
    %43 = tpu.matmul %39, %42, %cst_26 {dimension_numbers = #tpu.dot_dimension_numbers<[1], [0], [0], [1], [0, 0, 1, 1], [], []>} : vector<8x128xf32>, vector<128x128xf32>, vector<8x128xf32> -> vector<8x128xf32>
    %44 = vector.extract_strided_slice %21 {offsets = [2, 0], sizes = [1, 128], strides = [1, 1]} : vector<3x128xf32> to vector<1x128xf32>
    %45 = vector.broadcast %44 : vector<1x128xf32> to vector<8x128xf32>
    %46 = arith.addf %43, %45 : vector<8x128xf32>
    %c0_27 = arith.constant 0 : index
    %c0_28 = arith.constant 0 : index
    %47 = vector.load %arg7[%c0_27, %c0_28] : memref<128x256xf32, #tpu.memory_space<vmem>>, vector<128x256xf32>
    %cst_29 = arith.constant dense<0.000000e+00> : vector<8x256xf32>
    %48 = tpu.matmul %46, %47, %cst_29 {dimension_numbers = #tpu.dot_dimension_numbers<[1], [0], [0], [1], [0, 0, 1, 1], [], []>} : vector<8x128xf32>, vector<128x256xf32>, vector<8x256xf32> -> vector<8x256xf32>
    %c0_30 = arith.constant 0 : index
    %c0_31 = arith.constant 0 : index
    %49 = vector.load %arg11[%c0_30, %c0_31] : memref<8x128xf32, #tpu.memory_space<vmem>>, vector<8x128xf32>
    %50 = vector.extract_strided_slice %48 {offsets = [0, 0], sizes = [8, 128], strides = [1, 1]} : vector<8x256xf32> to vector<8x128xf32>
    %51 = arith.subf %49, %50 : vector<8x128xf32>
    %c0_32 = arith.constant 0 : index
    %c0_33 = arith.constant 0 : index
    %52 = vector.load %arg11[%c0_32, %c0_33] : memref<8x128xf32, #tpu.memory_space<vmem>>, vector<8x128xf32>
    tpu.vector_store %arg11[%c0_32, %c0_33], %51 {strides = array<i32>} : memref<8x128xf32, #tpu.memory_space<vmem>>, vector<8x128xf32>,
    %c0_34 = arith.constant 0 : index
    %c0_35 = arith.constant 0 : index
    %53 = vector.load %arg12[%c0_34, %c0_35] : memref<8x128xf32, #tpu.memory_space<vmem>>, vector<8x128xf32>
    %54 = vector.extract_strided_slice %48 {offsets = [0, 128], sizes = [8, 128], strides = [1, 1]} : vector<8x256xf32> to vector<8x128xf32>
    %55 = arith.addf %53, %54 : vector<8x128xf32>
    %c0_36 = arith.constant 0 : index
    %c0_37 = arith.constant 0 : index
    %56 = vector.load %arg12[%c0_36, %c0_37] : memref<8x128xf32, #tpu.memory_space<vmem>>, vector<8x128xf32>
    tpu.vector_store %arg12[%c0_36, %c0_37], %55 {strides = array<i32>} : memref<8x128xf32, #tpu.memory_space<vmem>>, vector<8x128xf32>,
    %c2_i32 = arith.constant 2 : i32
    %57 = arith.cmpi eq, %arg1, %c2_i32 : i32
    %58 = arith.extui %57 : i1 to i32
    %c0_i32_38 = arith.constant 0 : i32
    %59 = arith.cmpi ne, %58, %c0_i32_38 : i32
    scf.if %59 {
      %c0_39 = arith.constant 0 : index
      %c0_40 = arith.constant 0 : index
      %60 = vector.load %arg11[%c0_39, %c0_40] : memref<8x128xf32, #tpu.memory_space<vmem>>, vector<8x128xf32>
      %c0_41 = arith.constant 0 : index
      %c0_42 = arith.constant 0 : index
      %61 = vector.load %arg9[%c0_41, %c0_42] : memref<8x128xf32, #tpu.memory_space<vmem>>, vector<8x128xf32>
      tpu.vector_store %arg9[%c0_41, %c0_42], %60 {strides = array<i32>} : memref<8x128xf32, #tpu.memory_space<vmem>>, vector<8x128xf32>,
      %c0_43 = arith.constant 0 : index
      %c0_44 = arith.constant 0 : index
      %62 = vector.load %arg12[%c0_43, %c0_44] : memref<8x128xf32, #tpu.memory_space<vmem>>, vector<8x128xf32>
      %c0_45 = arith.constant 0 : index
      %c0_46 = arith.constant 0 : index
      %63 = vector.load %arg10[%c0_45, %c0_46] : memref<8x128xf32, #tpu.memory_space<vmem>>, vector<8x128xf32>
      tpu.vector_store %arg10[%c0_45, %c0_46], %62 {strides = array<i32>} : memref<8x128xf32, #tpu.memory_space<vmem>>, vector<8x128xf32>,
    } else {
    }
    return
  }
  func.func @transform_0(%arg0: i32, %arg1: i32) -> (i32, i32) {
    %c0_i32 = arith.constant 0 : i32
    %c0_i32_0 = arith.constant 0 : i32
    return %arg0, %c0_i32 : i32, i32
  }
  func.func @transform_1(%arg0: i32, %arg1: i32) -> (i32, i32, i32) {
    %c0_i32 = arith.constant 0 : i32
    %c0_i32_0 = arith.constant 0 : i32
    %c0_i32_1 = arith.constant 0 : i32
    %c0_i32_2 = arith.constant 0 : i32
    return %c0_i32, %c0_i32_0, %c0_i32_1 : i32, i32, i32
  }
  func.func @transform_2(%arg0: i32, %arg1: i32) -> (i32, i32, i32) {
    %c0_i32 = arith.constant 0 : i32
    %c0_i32_0 = arith.constant 0 : i32
    %c0_i32_1 = arith.constant 0 : i32
    %c0_i32_2 = arith.constant 0 : i32
    return %c0_i32, %c0_i32_0, %c0_i32_1 : i32, i32, i32
  }
  func.func @transform_3(%arg0: i32, %arg1: i32) -> (i32, i32, i32) {
    %c0_i32 = arith.constant 0 : i32
    %c0_i32_0 = arith.constant 0 : i32
    %c0_i32_1 = arith.constant 0 : i32
    %c0_i32_2 = arith.constant 0 : i32
    return %c0_i32, %c0_i32_0, %c0_i32_1 : i32, i32, i32
  }
  func.func @transform_4(%arg0: i32, %arg1: i32) -> (i32, i32, i32) {
    %c0_i32 = arith.constant 0 : i32
    %c0_i32_0 = arith.constant 0 : i32
    %c0_i32_1 = arith.constant 0 : i32
    %c0_i32_2 = arith.constant 0 : i32
    return %c0_i32, %c0_i32_0, %c0_i32_1 : i32, i32, i32
  }
  func.func @transform_5(%arg0: i32, %arg1: i32) -> (i32, i32) {
    %c0_i32 = arith.constant 0 : i32
    %c0_i32_0 = arith.constant 0 : i32
    %c0_i32_1 = arith.constant 0 : i32
    return %c0_i32, %c0_i32_0 : i32, i32
  }
  func.func @transform_6(%arg0: i32, %arg1: i32) -> (i32, i32, i32) {
    %c0_i32 = arith.constant 0 : i32
    %c0_i32_0 = arith.constant 0 : i32
    %c0_i32_1 = arith.constant 0 : i32
    %c0_i32_2 = arith.constant 0 : i32
    return %c0_i32, %c0_i32_0, %c0_i32_1 : i32, i32, i32
  }
  func.func @transform_7(%arg0: i32, %arg1: i32) -> (i32, i32) {
    %c0_i32 = arith.constant 0 : i32
    %c0_i32_0 = arith.constant 0 : i32
    return %arg0, %c0_i32 : i32, i32
  }
  func.func @transform_8(%arg0: i32, %arg1: i32) -> (i32, i32) {
    %c0_i32 = arith.constant 0 : i32
    %c0_i32_0 = arith.constant 0 : i32
    return %arg0, %c0_i32 : i32, i32
  }
}

</mosaic_0001>

<bundles_post_ra>
// kernel: tpu_custom_call.1
= control target key start
LH: loop header
LB: loop body
LE: loop exit
PB: predicated region body
PF: predicated region fallthrough
CT: control target
= control target key end

     0   :  { %14 = vsyncpa [#allocation5], 0  ;;  %s2537_s0 = inlined_call_operand.hbm [shape: f32[8,128], index: 0, kind: input, shape index: {}]   ;;  %s2538_s1 = inlined_call_operand.hbm [shape: f32[3,128,128], index: 1, kind: input, shape index: {}]   ;;  %s2539_s2 = inlined_call_operand.hbm [shape: f32[3,128,128], index: 2, kind: input, shape index: {}]   ;;  %s2540_s3 = inlined_call_operand.hbm [shape: f32[3,128,128], index: 3, kind: input, shape index: {}]   ;;  %s2541_s4 = inlined_call_operand.hbm [shape: f32[3,3,128], index: 4, kind: input, shape index: {}]   ;;  %s2542_s5 = inlined_call_operand.hbm [shape: f32[128,256], index: 5, kind: input, shape index: {}]   ;;  %s2543_s6 = inlined_call_operand.hbm [shape: f32[4,128,128], index: 6, kind: input, shape index: {}]   ;;  %s2544_s7 = inlined_call_operand.hbm [shape: f32[8,128], index: 7, kind: output, shape index: {0}]   ;;  %s2545_s8 = inlined_call_operand.hbm [shape: f32[8,128], index: 8, kind: output, shape index: {1}]  }
   0x1   :  { %15 = vsyncpa [#allocation8], 0 }
   0x2   :  { %16 = vsyncpa [#allocation11], 0 }
   0x3   :  { %17 = vsyncpa [#allocation14], 0 }
   0x4   :  { %18 = vsyncpa [#allocation6], 0 }
   0x5   :  { %19 = vsyncpa [#allocation18], 0  ;;  %s2155_s27 = smov 0   ;;  %s2157_s28 = smov 0  }
   0x6   :  { %s2159_s29 = smov 0  }
   0x7 LB: > { %s2092_s30 = smov [#allocation7]   ;;  %s1305_s10 = sadd.s32 4294967295, %s2090_s29   ;;  %s2090_s29 = sphi %s2159_s29, %s25_s29   ;;  %s2086_s28 = sphi %s2157_s28, %s2552_s28   ;;  %s2082_s27 = sphi %s2155_s27, %s2551_s27  }
   0x8   : > { %s271_s9 = sshll.u32 %s2092_s30, 4  ;;  %p1306_p0 = scmp.ge.s32.totalorder %s2090_s29, 1  ;;  %s272_s9 = int_to_ptr.vmem [resolvable:$true] %s271_s9 }
   0x9   : > { %p246_p1 = scmp.lt.s32.totalorder %s2090_s29, 4  ;;  %p2175_p2 = scmp.eq.s32.totalorder %s1305_s10, 0 }
   0xa   : > { %s2093_s13 = smov [#allocation10]   ;;  %s2094_s16 = smov [#allocation13]  }
   0xb   : > { %p2179_p3 = pnand %p1306_p0, %p246_p1  ;;  %s297_s14 = sshll.u32 %s2093_s13, 4  ;;  %s2185_s14 = int_to_ptr.vmem [resolvable:$true] %s297_s14 }
   0xc   : > { %s323_s17 = sshll.u32 %s2094_s16, 4  ;;  %s1825_s19 = scalar_lea.vmem %s272_s9, 6144  ;;  %s2193_s17 = int_to_ptr.vmem [resolvable:$true] %s323_s17 }
   0xd   : > { %p1732_p4 = pneg %p2179_p3  ;;  %p1826_p7 = scmp.ne.s32.totalorder %s272_s9, %s1825_s19 }
   0xe   : > { %p1833_p10 = scmp.lt.s32.totalorder %s272_s9, %s272_s9  ;;  %p1834_p11 = scmp.lt.s32.totalorder %s1825_s19, %s1825_s19 }
   0xf   : > { %p2189_p5 = pnand %p2175_p2, %p1732_p4 }
  0x10   : > { %p1835_p12 = por %p1834_p11, %p1833_p10 }
  0x11   : > { %p2197_p6 = pneg %p2189_p5 }
  0x13   : > { %p1828_p8 = pnand %p1826_p7, %p2197_p6 }
  0x15   : > { %p1829_p9 = pneg %p1828_p8 }
  0x17   : > { %p1836_p13 = pnand %p1835_p12, %p1829_p9 }
  0x19   : > { %1839 = shalt.err (!%p1836_p13)
}
  0x1a   : > { %s2095_s20 = smov 128   ;;  %s2096_s21 = smov 8  }
  0x1b   : > { %1738 = dma.hbm_to_vmem [thread:$0]  (!%p2189_p5), %s2538_s1, 6144, %s272_s9, [#allocation8], %s2095_s20, %s2095_s20, %s2096_s21  }
  0x1c   : > { %s1851_s24 = scalar_lea.vmem %s2185_s14, 6144  ;;  %p1859_p7 = scmp.lt.s32.totalorder %s2185_s14, %s2185_s14 }
  0x1d   : > { %p1852_p0 = scmp.ne.s32.totalorder %s2185_s14, %s1851_s24  ;;  %p1860_p8 = scmp.lt.s32.totalorder %s1851_s24, %s1851_s24 }
  0x1f   : > { %p1854_p1 = pnand %p1852_p0, %p2197_p6  ;;  %p1861_p9 = por %p1860_p8, %p1859_p7 }
  0x21   : > { %p1855_p4 = pneg %p1854_p1 }
  0x23   : > { %p1862_p10 = pnand %p1861_p9, %p1855_p4 }
  0x25   : > { %1865 = shalt.err (!%p1862_p10)
}
  0x26   : > { %1744 = dma.hbm_to_vmem [thread:$0]  (!%p2189_p5), %s2540_s3, 6144, %s2185_s14, [#allocation11], %s2095_s20, %s2095_s20, %s2096_s21  }
  0x27   : > { %s1877_s30 = scalar_lea.vmem %s2193_s17, 4096  ;;  %p1885_p0 = scmp.lt.s32.totalorder %s2193_s17, %s2193_s17 }
  0x28   : > { %p1878_p11 = scmp.ne.s32.totalorder %s2193_s17, %s1877_s30  ;;  %p1886_p1 = scmp.lt.s32.totalorder %s1877_s30, %s1877_s30 }
  0x2a   : > { %p1880_p12 = pnand %p1878_p11, %p2197_p6  ;;  %p1887_p4 = por %p1886_p1, %p1885_p0 }
  0x2c   : > { %p1881_p13 = pneg %p1880_p12 }
  0x2e   : > { %p1888_p7 = pnand %p1887_p4, %p1881_p13 }
  0x30   : > { %1891 = shalt.err (!%p1888_p7)
}
  0x31   : > { %s2097_s9 = smov 256   ;;  %s2098_s13 = smov 16  }
  0x32   : > { %1750 = dma.hbm_to_vmem [thread:$0]  (!%p2189_p5), %s2542_s5, 4096, %s2193_s17, [#allocation14], %s2097_s9, %s2097_s9, %s2098_s13  }
  0x33   : > { %s34_s19 = sadd.s32 1, %s2086_s28  ;;  %s2099_s22 = smov [#allocation4]  }
  0x34   : > { %p35_p8 = scmp.ge.s32.totalorder %s34_s19, 3  ;;  %s261_s23 = sshll.u32 %s2099_s22, 4  ;;  %s262_s23 = int_to_ptr.vmem [resolvable:$true] %s261_s23 }
  0x35   : > { %s1903_s24 = scalar_lea.vmem %s262_s23, 128  ;;  %p1911_p12 = scmp.lt.s32.totalorder %s262_s23, %s262_s23 }
  0x36   : > { %s2554_s19 = smov (%p35_p8, %s34_s19), 0  ;;  %p1904_p9 = scmp.ne.s32.totalorder %s262_s23, %s1903_s24 }
  0x37   : > { %p1912_p13 = scmp.lt.s32.totalorder %s1903_s24, %s1903_s24 }
  0x38   : > { %p1906_p10 = pnand %p1904_p9, %p2197_p6 }
  0x39   : > { %p1913_p0 = por %p1912_p13, %p1911_p12 }
  0x3a   : > { %p1907_p11 = pneg %p1906_p10 }
  0x3c   : > { %p1914_p1 = pnand %p1913_p0, %p1907_p11 }
  0x3e   : > { %1917 = shalt.err (!%p1914_p1)
}
  0x3f   : > { %1735 = dma.hbm_to_vmem [thread:$0]  (!%p2189_p5), %s2537_s0, 128, %s262_s23, [#allocation5]  }
  0x40   : > { %s2100_s26 = smov [#allocation9]   ;;  %s2101_s9 = smov [#allocation12]  }
  0x41   : > { %s284_s30 = sshll.u32 %s2100_s26, 4  ;;  %s310_s13 = sshll.u32 %s2101_s9, 4  ;;  %s285_s30 = int_to_ptr.vmem [resolvable:$true] %s284_s30  ;;  %s311_s13 = int_to_ptr.vmem [resolvable:$true] %s310_s13 }
  0x42   : > { %s1929_s16 = scalar_lea.vmem %s285_s30, 6144  ;;  %p1937_p9 = scmp.lt.s32.totalorder %s285_s30, %s285_s30 }
  0x43   : > { %p1930_p4 = scmp.ne.s32.totalorder %s285_s30, %s1929_s16  ;;  %p1938_p10 = scmp.lt.s32.totalorder %s1929_s16, %s1929_s16 }
  0x45   : > { %p1932_p7 = pnand %p1930_p4, %p2197_p6  ;;  %p1939_p11 = por %p1938_p10, %p1937_p9 }
  0x47   : > { %p1933_p8 = pneg %p1932_p7 }
  0x49   : > { %p1940_p12 = pnand %p1939_p11, %p1933_p8 }
  0x4b   : > { %1943 = shalt.err (!%p1940_p12)
}
  0x4c   : > { %1741 = dma.hbm_to_vmem [thread:$0]  (!%p2189_p5), %s2539_s2, 6144, %s285_s30, [#allocation8], %s2095_s20, %s2095_s20, %s2096_s21  }
  0x4d   : > { %s1955_s23 = scalar_lea.vmem %s311_s13, 192  ;;  %p1963_p4 = scmp.lt.s32.totalorder %s311_s13, %s311_s13 }
  0x4e   : > { %p1956_p13 = scmp.ne.s32.totalorder %s311_s13, %s1955_s23  ;;  %p1964_p7 = scmp.lt.s32.totalorder %s1955_s23, %s1955_s23 }
  0x50   : > { %p1958_p0 = pnand %p1956_p13, %p2197_p6  ;;  %p1965_p8 = por %p1964_p7, %p1963_p4 }
  0x52   : > { %p1959_p1 = pneg %p1958_p0 }
  0x54   : > { %p1966_p9 = pnand %p1965_p8, %p1959_p1 }
  0x56   : > { %1969 = shalt.err (!%p1966_p9)
}
  0x57   : > { %s2102_s24 = smov 64   ;;  %s2103_s17 = smov 4  }
  0x58   : > { %1747 = dma.hbm_to_vmem [thread:$0]  (!%p2189_p5), %s2541_s4, 192, %s311_s13, [#allocation11], %s2102_s24, %s2102_s24, %s2103_s17  }
  0x59   : > { %s2104_s30 = smov [#allocation15]  }
  0x5a   : > { %s336_s9 = sshll.u32 %s2104_s30, 4  ;;  %s337_s9 = int_to_ptr.vmem [resolvable:$true] %s336_s9 }
  0x5b   : > { %s1981_s16 = scalar_lea.vmem %s337_s9, 8192  ;;  %p1989_p13 = scmp.lt.s32.totalorder %s337_s9, %s337_s9 }
  0x5c   : > { %p1982_p10 = scmp.ne.s32.totalorder %s337_s9, %s1981_s16  ;;  %p1990_p0 = scmp.lt.s32.totalorder %s1981_s16, %s1981_s16 }
  0x5e   : > { %p1984_p11 = pnand %p1982_p10, %p2197_p6  ;;  %p1991_p1 = por %p1990_p0, %p1989_p13 }
  0x60   : > { %p1985_p12 = pneg %p1984_p11 }
  0x62   : > { %p1992_p4 = pnand %p1991_p1, %p1985_p12 }
  0x64   : > { %1995 = shalt.err (!%p1992_p4)
}
  0x65   : > { %1753 = dma.hbm_to_vmem [thread:$0]  (!%p2189_p5), %s2543_s6, 8192, %s337_s9, [#allocation14], %s2095_s20, %s2095_s20, %s2096_s21  }
  0x66   : > { %352 = sbr.rel (%p2179_p3) target bundleno = 1211 (0x4bb), region = 48 }
  0x6b   : > { %2057 = dma.done.wait (%p2175_p2), [#allocation5], 128  }
  0x6c   : > { %2059 = vsyncadd (%p2175_p2), [#allocation5], 4294967168 }
  0x6d   : > { %2061 = dma.done.wait (%p2175_p2), [#allocation8], 12288  }
  0x6e   : > { %2063 = vsyncadd (%p2175_p2), [#allocation8], 4294955008 }
  0x6f   : > { %2065 = dma.done.wait (%p2175_p2), [#allocation11], 6336  }
  0x70   : > { %2067 = vsyncadd (%p2175_p2), [#allocation11], 4294960960 }
  0x71   : > { %2069 = dma.done.wait (%p2175_p2), [#allocation14], 12288  }
  0x72   : > { %2071 = vsyncadd (%p2175_p2), [#allocation14], 4294955008  ;;  %p1322_p3 = scmp.ne.s32.totalorder %s2082_s27, 0 }
  0x74   : > { %403 = sbr.rel (%p1322_p3) target bundleno = 123 (0x7b), region = 80 }
  0x79   : > { %v404_v0 = vld [vmem:[#allocation4] sm:$0xff]  ;;  %v2105_v1 = vmov 0.0  }
  0x7a   : > { %405 = vst [vmem:[#allocation2] sm:$0xff] %v404_v0  ;;  %406 = vst [vmem:[#allocation3] sm:$0xff] %v2105_v1 }
  0x7b PF: > { %v423_v2 = vld [vmem:[#allocation15 + $0x78] sm:$0xff]  ;;  %v2106_v4 = vmov 0.0   ;;  %v422_v5 = vld [vmem:[#allocation15 + $0x70] sm:$0xff]  ;;  %v421_v7 = vld [vmem:[#allocation15 + $0x68] sm:$0xff]  ;;  %vm2107_vm0 = vmmov 0   ;;  %s2379_s11 = sshll.u32 %s2082_s27, 7 }
  0x7c   : > { %v510_v3 = vld [vmem:[#allocation15 + $0xf8] sm:$0xff]  ;;  %1451 = vmatprep.subr.mxu0 %v2106_v4  ;;  %1486 = vmatprep.subr.mxu1 %v2106_v4  ;;  %v509_v6 = vld [vmem:[#allocation15 + $0xf0] sm:$0xff]  ;;  %v508_v8 = vld [vmem:[#allocation15 + $0xe8] sm:$0xff]  ;;  %s2382_s12 = scalar_lea.vmem [#allocation7], %s2379_s11  ;;  %s2417_s15 = scalar_lea.vmem [#allocation9], %s2379_s11 }
  0x7d   : > { %1452 = vmatpush3.msra.mxu0 %v423_v2  ;;  %1487 = vmatpush3.msra.mxu1 %v510_v3  ;;  %v420_v9 = vld [vmem:[#allocation15 + $0x60] sm:$0xff]  ;;  %v419_v11 = vld [vmem:[#allocation15 + $0x58] sm:$0xff]  ;;  %v418_v13 = vld [vmem:[#allocation15 + $0x50] sm:$0xff]  ;;  %s2453_s18 = scalar_lea.vmem [#allocation10], %s2379_s11  ;;  %s1323_s20 = sshll.u32 %s2082_s27, 2 }
  0x7e   : > { %1453 = vmatprep.subr.mxu0 %v2106_v4  ;;  %1488 = vmatprep.subr.mxu1 %v2106_v4  ;;  %v507_v10 = vld [vmem:[#allocation15 + $0xe0] sm:$0xff]  ;;  %v506_v12 = vld [vmem:[#allocation15 + $0xd8] sm:$0xff]  ;;  %v505_v14 = vld [vmem:[#allocation15 + $0xd0] sm:$0xff]  ;;  %s759_s21 = scalar_lea.vmem [#allocation12], %s1323_s20  ;;  %p1325_p2 = scmp.ne.s32.totalorder %s2082_s27, 2 }
  0x7f   : > { %1454 = vmatpush3.msra.mxu0 %v422_v5  ;;  %1489 = vmatpush3.msra.mxu1 %v509_v6  ;;  %v417_v15 = vld [vmem:[#allocation15 + $0x48] sm:$0xff]  ;;  %v416_v17 = vld [vmem:[#allocation15 + $0x40] sm:$0xff]  ;;  %v415_v19 = vld [vmem:[#allocation15 + $0x38] sm:$0xff] }
  0x80   : > { %1455 = vmatprep.subr.mxu0 %v2106_v4  ;;  %1490 = vmatprep.subr.mxu1 %v2106_v4  ;;  %v504_v16 = vld [vmem:[#allocation15 + $0xc8] sm:$0xff]  ;;  %v503_v18 = vld [vmem:[#allocation15 + $0xc0] sm:$0xff]  ;;  %v502_v20 = vld [vmem:[#allocation15 + $0xb8] sm:$0xff] }
  0x81   : > { %1456 = vmatpush3.msra.mxu0 %v421_v7  ;;  %1491 = vmatpush3.msra.mxu1 %v508_v8  ;;  %v414_v21 = vld [vmem:[#allocation15 + $0x30] sm:$0xff]  ;;  %v413_v23 = vld [vmem:[#allocation15 + $0x28] sm:$0xff]  ;;  %v412_v25 = vld [vmem:[#allocation15 + $0x20] sm:$0xff] }
  0x82   : > { %1457 = vmatprep.subr.mxu0 %v2106_v4  ;;  %1492 = vmatprep.subr.mxu1 %v2106_v4  ;;  %v501_v22 = vld [vmem:[#allocation15 + $0xb0] sm:$0xff]  ;;  %v500_v24 = vld [vmem:[#allocation15 + $0xa8] sm:$0xff]  ;;  %v499_v26 = vld [vmem:[#allocation15 + $0xa0] sm:$0xff] }
  0x83   : > { %1458 = vmatpush3.msra.mxu0 %v420_v9  ;;  %1493 = vmatpush3.msra.mxu1 %v507_v10  ;;  %v411_v27 = vld [vmem:[#allocation15 + $0x18] sm:$0xff]  ;;  %v410_v29 = vld [vmem:[#allocation15 + $0x10] sm:$0xff]  ;;  %v409_v31 = vld [vmem:[#allocation15 + $0x8] sm:$0xff] }
  0x84   : > { %1459 = vmatprep.subr.mxu0 %v2106_v4  ;;  %1494 = vmatprep.subr.mxu1 %v2106_v4  ;;  %v498_v28 = vld [vmem:[#allocation15 + $0x98] sm:$0xff]  ;;  %v497_v30 = vld [vmem:[#allocation15 + $0x90] sm:$0xff]  ;;  %v496_v32 = vld [vmem:[#allocation15 + $0x88] sm:$0xff] }
  0x85   : > { %1460 = vmatpush3.msra.mxu0 %v419_v11  ;;  %1495 = vmatpush3.msra.mxu1 %v506_v12  ;;  %v408_v33 = vld [vmem:[#allocation15] sm:$0xff]  ;;  %v598_v36 = vld [vmem:[#allocation15 + $0x178] sm:$0xff]  ;;  %v597_v38 = vld [vmem:[#allocation15 + $0x170] sm:$0xff] }
  0x86   : > { %1461 = vmatprep.subr.mxu0 %v2106_v4  ;;  %1496 = vmatprep.subr.mxu1 %v2106_v4  ;;  %v495_v34 = vld [vmem:[#allocation15 + $0x80] sm:$0xff]  ;;  %v686_v37 = vld [vmem:[#allocation15 + $0x1f8] sm:$0xff]  ;;  %v685_v39 = vld [vmem:[#allocation15 + $0x1f0] sm:$0xff] }
  0x87   : > { %1462 = vmatpush3.msra.mxu0 %v418_v13  ;;  %1497 = vmatpush3.msra.mxu1 %v505_v14  ;;  %v2324_v35 = vld [vmem:[#allocation2] sm:$0xff]  ;;  %v596_v40 = vld [vmem:[#allocation15 + $0x168] sm:$0xff]  ;;  %v593_v46 = vld [vmem:[#allocation15 + $0x150] sm:$0xff] }
  0x88   : > { %1463 = vmatprep.subr.mxu0 %v2106_v4  ;;  %1498 = vmatprep.subr.mxu1 %v2106_v4  ;;  %v684_v41 = vld [vmem:[#allocation15 + $0x1e8] sm:$0xff]  ;;  %v595_v42 = vld [vmem:[#allocation15 + $0x160] sm:$0xff]  ;;  %v594_v44 = vld [vmem:[#allocation15 + $0x158] sm:$0xff] }
  0x89   : > { %1464 = vmatpush3.msra.mxu0 %v417_v15  ;;  %1499 = vmatpush3.msra.mxu1 %v504_v16  ;;  %v683_v43 = vld [vmem:[#allocation15 + $0x1e0] sm:$0xff]  ;;  %v682_v45 = vld [vmem:[#allocation15 + $0x1d8] sm:$0xff]  ;;  %v681_v47 = vld [vmem:[#allocation15 + $0x1d0] sm:$0xff] }
  0x8a   : > { %1465 = vmatprep.subr.mxu0 %v2106_v4  ;;  %1500 = vmatprep.subr.mxu1 %v2106_v4  ;;  %v592_v48 = vld [vmem:[#allocation15 + $0x148] sm:$0xff]  ;;  %v591_v50 = vld [vmem:[#allocation15 + $0x140] sm:$0xff]  ;;  %v590_v52 = vld [vmem:[#allocation15 + $0x138] sm:$0xff] }
  0x8b   : > { %1466 = vmatpush3.msra.mxu0 %v416_v17  ;;  %1501 = vmatpush3.msra.mxu1 %v503_v18  ;;  %v680_v49 = vld [vmem:[#allocation15 + $0x1c8] sm:$0xff]  ;;  %v679_v51 = vld [vmem:[#allocation15 + $0x1c0] sm:$0xff]  ;;  %v678_v53 = vld [vmem:[#allocation15 + $0x1b8] sm:$0xff] }
  0x8c   : > { %1467 = vmatprep.subr.mxu0 %v2106_v4  ;;  %1502 = vmatprep.subr.mxu1 %v2106_v4  ;;  %v589_v54 = vld [vmem:[#allocation15 + $0x130] sm:$0xff]  ;;  %v588_v56 = vld [vmem:[#allocation15 + $0x128] sm:$0xff]  ;;  %v587_v58 = vld [vmem:[#allocation15 + $0x120] sm:$0xff] }
  0x8d   : > { %1468 = vmatpush3.msra.mxu0 %v415_v19  ;;  %1503 = vmatpush3.msra.mxu1 %v502_v20  ;;  %v677_v55 = vld [vmem:[#allocation15 + $0x1b0] sm:$0xff]  ;;  %v676_v57 = vld [vmem:[#allocation15 + $0x1a8] sm:$0xff]  ;;  %v675_v59 = vld [vmem:[#allocation15 + $0x1a0] sm:$0xff] }
  0x8e   : > { %1469 = vmatprep.subr.mxu0 %v2106_v4  ;;  %1504 = vmatprep.subr.mxu1 %v2106_v4  ;;  %v586_v60 = vld [vmem:[#allocation15 + $0x118] sm:$0xff]  ;;  %v585_v62 = vld [vmem:[#allocation15 + $0x110] sm:$0xff]  ;;  %v584_v0 = vld [vmem:[#allocation15 + $0x108] sm:$0xff] }
  0x8f   : > { %1470 = vmatpush3.msra.mxu0 %v414_v21  ;;  %1505 = vmatpush3.msra.mxu1 %v501_v22  ;;  %v674_v61 = vld [vmem:[#allocation15 + $0x198] sm:$0xff]  ;;  %v673_v63 = vld [vmem:[#allocation15 + $0x190] sm:$0xff]  ;;  %v672_v1 = vld [vmem:[#allocation15 + $0x188] sm:$0xff] }
  0x90   : > { %1471 = vmatprep.subr.mxu0 %v2106_v4  ;;  %1506 = vmatprep.subr.mxu1 %v2106_v4  ;;  %v583_v2 = vld [vmem:[#allocation15 + $0x100] sm:$0xff]  ;;  %v778_v5 = vld [vmem:[%s2382_s12 + $0x78] sm:$0xff]  ;;  %v777_v6 = vld [vmem:[%s2382_s12 + $0x70] sm:$0xff] }
  0x91   : > { %1472 = vmatpush3.msra.mxu0 %v413_v23  ;;  %1507 = vmatpush3.msra.mxu1 %v500_v24  ;;  %v671_v3 = vld [vmem:[#allocation15 + $0x180] sm:$0xff]  ;;  %v774_v9 = vld [vmem:[%s2382_s12 + $0x58] sm:$0xff]  ;;  %v773_v10 = vld [vmem:[%s2382_s12 + $0x50] sm:$0xff] }
  0x92   : > { %1473 = vmatprep.subr.mxu0 %v2106_v4  ;;  %1508 = vmatprep.subr.mxu1 %v2106_v4  ;;  %v776_v7 = vld [vmem:[%s2382_s12 + $0x68] sm:$0xff]  ;;  %v775_v8 = vld [vmem:[%s2382_s12 + $0x60] sm:$0xff]  ;;  %v770_v13 = vld [vmem:[%s2382_s12 + $0x38] sm:$0xff] }
  0x93   : > { %1474 = vmatpush3.msra.mxu0 %v412_v25  ;;  %1509 = vmatpush3.msra.mxu1 %v499_v26  ;;  %v772_v11 = vld [vmem:[%s2382_s12 + $0x48] sm:$0xff]  ;;  %v771_v12 = vld [vmem:[%s2382_s12 + $0x40] sm:$0xff]  ;;  %v769_v14 = vld [vmem:[%s2382_s12 + $0x30] sm:$0xff] }
  0x94   : > { %1475 = vmatprep.subr.mxu0 %v2106_v4  ;;  %1510 = vmatprep.subr.mxu1 %v2106_v4  ;;  %v768_v15 = vld [vmem:[%s2382_s12 + $0x28] sm:$0xff]  ;;  %v767_v16 = vld [vmem:[%s2382_s12 + $0x20] sm:$0xff]  ;;  %v766_v17 = vld [vmem:[%s2382_s12 + $0x18] sm:$0xff] }
  0x95   : > { %1476 = vmatpush3.msra.mxu0 %v411_v27  ;;  %1511 = vmatpush3.msra.mxu1 %v498_v28  ;;  %v765_v18 = vld [vmem:[%s2382_s12 + $0x10] sm:$0xff]  ;;  %v764_v19 = vld [vmem:[%s2382_s12 + $0x8] sm:$0xff]  ;;  %v763_v20 = vld [vmem:[%s2382_s12] sm:$0xff] }
  0x96   : > { %1477 = vmatprep.subr.mxu0 %v2106_v4  ;;  %1512 = vmatprep.subr.mxu1 %v2106_v4  ;;  %v870_v21 = vld [vmem:[%s2417_s15 + $0x78] sm:$0xff]  ;;  %v869_v22 = vld [vmem:[%s2417_s15 + $0x70] sm:$0xff]  ;;  %v868_v23 = vld [vmem:[%s2417_s15 + $0x68] sm:$0xff] }
  0x97   : > { %1478 = vmatpush3.msra.mxu0 %v410_v29  ;;  %1513 = vmatpush3.msra.mxu1 %v497_v30  ;;  %v867_v24 = vld [vmem:[%s2417_s15 + $0x60] sm:$0xff]  ;;  %v866_v25 = vld [vmem:[%s2417_s15 + $0x58] sm:$0xff]  ;;  %v865_v26 = vld [vmem:[%s2417_s15 + $0x50] sm:$0xff] }
  0x98   : > { %1479 = vmatprep.subr.mxu0 %v2106_v4  ;;  %1514 = vmatprep.subr.mxu1 %v2106_v4  ;;  %v864_v27 = vld [vmem:[%s2417_s15 + $0x48] sm:$0xff]  ;;  %v863_v28 = vld [vmem:[%s2417_s15 + $0x40] sm:$0xff]  ;;  %v862_v29 = vld [vmem:[%s2417_s15 + $0x38] sm:$0xff] }
  0x99   : > { %1480 = vmatpush3.msra.mxu0 %v409_v31  ;;  %1515 = vmatpush3.msra.mxu1 %v496_v32  ;;  %v861_v30 = vld [vmem:[%s2417_s15 + $0x30] sm:$0xff]  ;;  %v860_v31 = vld [vmem:[%s2417_s15 + $0x28] sm:$0xff]  ;;  %v859_v32 = vld [vmem:[%s2417_s15 + $0x20] sm:$0xff] }
  0x9a   : > { %1481 = vmatprep.subr.mxu0 %v2106_v4  ;;  %1516 = vmatprep.subr.mxu1 %v2106_v4 }
  0x9b   : > { %1482 = vmatpush3.msra.mxu0 %v408_v33  ;;  %1483 = vmatprep.mubr.msk.f32.mxu0 %vm2107_vm0, %v2106_v4  ;;  %v858_v33 = vld [vmem:[%s2417_s15 + $0x18] sm:$0xff] }
  0x9c   : > { %1517 = vmatpush3.msra.mxu1 %v495_v34  ;;  %1484 = vmatmul.mubr.f32.vlgmr.msra.gmra.mxu0 %v2324_v35 }
  0x9d   : > { %1518 = vmatprep.mubr.msk.f32.mxu1 %vm2107_vm0, %v2106_v4  ;;  %1521 = vmatprep.subr.mxu0 %v2106_v4 }
  0x9e   : > { %1556 = vmatprep.subr.mxu1 %v2106_v4  ;;  %1519 = vmatmul.mubr.f32.vlgmr.msra.gmra.mxu1 %v2324_v35 }
  0x9f   : > { %1522 = vmatpush3.msra.mxu0 %v598_v36  ;;  %1557 = vmatpush3.msra.mxu1 %v686_v37 }
  0xa0   : > { %1523 = vmatprep.subr.mxu0 %v2106_v4  ;;  %1558 = vmatprep.subr.mxu1 %v2106_v4 }
  0xa1   : > { %1524 = vmatpush3.msra.mxu0 %v597_v38  ;;  %1559 = vmatpush3.msra.mxu1 %v685_v39 }
  0xa2   : > { %1525 = vmatprep.subr.mxu0 %v2106_v4  ;;  %1560 = vmatprep.subr.mxu1 %v2106_v4 }
  0xa3   : > { %1526 = vmatpush3.msra.mxu0 %v596_v40  ;;  %1561 = vmatpush3.msra.mxu1 %v684_v41 }
  0xa4   : > { %1527 = vmatprep.subr.mxu0 %v2106_v4  ;;  %1562 = vmatprep.subr.mxu1 %v2106_v4 }
  0xa5   : > { %1528 = vmatpush3.msra.mxu0 %v595_v42  ;;  %1563 = vmatpush3.msra.mxu1 %v683_v43 }
  0xa6   : > { %1529 = vmatprep.subr.mxu0 %v2106_v4  ;;  %1564 = vmatprep.subr.mxu1 %v2106_v4 }
  0xa7   : > { %1530 = vmatpush3.msra.mxu0 %v594_v44  ;;  %1565 = vmatpush3.msra.mxu1 %v682_v45 }
  0xa8   : > { %1531 = vmatprep.subr.mxu0 %v2106_v4  ;;  %1566 = vmatprep.subr.mxu1 %v2106_v4 }
  0xa9   : > { %1532 = vmatpush3.msra.mxu0 %v593_v46  ;;  %1567 = vmatpush3.msra.mxu1 %v681_v47  ;;  %v857_v46 = vld [vmem:[%s2417_s15 + $0x10] sm:$0xff]  ;;  %v856_v47 = vld [vmem:[%s2417_s15 + $0x8] sm:$0xff] }
  0xaa   : > { %1533 = vmatprep.subr.mxu0 %v2106_v4  ;;  %1568 = vmatprep.subr.mxu1 %v2106_v4 }
  0xab   : > { %1534 = vmatpush3.msra.mxu0 %v592_v48  ;;  %1569 = vmatpush3.msra.mxu1 %v680_v49  ;;  %v855_v48 = vld [vmem:[%s2417_s15] sm:$0xff]  ;;  %v962_v49 = vld [vmem:[%s2453_s18 + $0x78] sm:$0xff] }
  0xac   : > { %1535 = vmatprep.subr.mxu0 %v2106_v4  ;;  %1570 = vmatprep.subr.mxu1 %v2106_v4 }
  0xad   : > { %1536 = vmatpush3.msra.mxu0 %v591_v50  ;;  %1571 = vmatpush3.msra.mxu1 %v679_v51  ;;  %v961_v50 = vld [vmem:[%s2453_s18 + $0x70] sm:$0xff]  ;;  %v960_v51 = vld [vmem:[%s2453_s18 + $0x68] sm:$0xff] }
  0xae   : > { %1537 = vmatprep.subr.mxu0 %v2106_v4  ;;  %1572 = vmatprep.subr.mxu1 %v2106_v4 }
  0xaf   : > { %1538 = vmatpush3.msra.mxu0 %v590_v52  ;;  %1573 = vmatpush3.msra.mxu1 %v678_v53  ;;  %v959_v52 = vld [vmem:[%s2453_s18 + $0x60] sm:$0xff]  ;;  %v958_v53 = vld [vmem:[%s2453_s18 + $0x58] sm:$0xff] }
  0xb0   : > { %1539 = vmatprep.subr.mxu0 %v2106_v4  ;;  %1574 = vmatprep.subr.mxu1 %v2106_v4 }
  0xb1   : > { %1540 = vmatpush3.msra.mxu0 %v589_v54  ;;  %1575 = vmatpush3.msra.mxu1 %v677_v55  ;;  %v957_v54 = vld [vmem:[%s2453_s18 + $0x50] sm:$0xff]  ;;  %v956_v55 = vld [vmem:[%s2453_s18 + $0x48] sm:$0xff] }
  0xb2   : > { %1541 = vmatprep.subr.mxu0 %v2106_v4  ;;  %1576 = vmatprep.subr.mxu1 %v2106_v4 }
  0xb3   : > { %1542 = vmatpush3.msra.mxu0 %v588_v56  ;;  %1577 = vmatpush3.msra.mxu1 %v676_v57  ;;  %v955_v56 = vld [vmem:[%s2453_s18 + $0x40] sm:$0xff]  ;;  %v954_v57 = vld [vmem:[%s2453_s18 + $0x38] sm:$0xff] }
  0xb4   : > { %1543 = vmatprep.subr.mxu0 %v2106_v4  ;;  %1578 = vmatprep.subr.mxu1 %v2106_v4 }
  0xb5   : > { %1544 = vmatpush3.msra.mxu0 %v587_v58  ;;  %1579 = vmatpush3.msra.mxu1 %v675_v59  ;;  %v953_v58 = vld [vmem:[%s2453_s18 + $0x30] sm:$0xff]  ;;  %v952_v59 = vld [vmem:[%s2453_s18 + $0x28] sm:$0xff] }
  0xb6   : > { %1545 = vmatprep.subr.mxu0 %v2106_v4  ;;  %1580 = vmatprep.subr.mxu1 %v2106_v4 }
  0xb7   : > { %1546 = vmatpush3.msra.mxu0 %v586_v60  ;;  %1581 = vmatpush3.msra.mxu1 %v674_v61  ;;  %v951_v60 = vld [vmem:[%s2453_s18 + $0x20] sm:$0xff]  ;;  %v950_v61 = vld [vmem:[%s2453_s18 + $0x18] sm:$0xff] }
  0xb8   : > { %1547 = vmatprep.subr.mxu0 %v2106_v4  ;;  %1582 = vmatprep.subr.mxu1 %v2106_v4 }
  0xb9   : > { %1548 = vmatpush3.msra.mxu0 %v585_v62  ;;  %1583 = vmatpush3.msra.mxu1 %v673_v63  ;;  %v779_v62 = vlaneseq }
  0xba   : > { %1549 = vmatprep.subr.mxu0 %v2106_v4  ;;  %1584 = vmatprep.subr.mxu1 %v2106_v4 }
  0xbb   : > { %1550 = vmatpush3.msra.mxu0 %v584_v0  ;;  %1585 = vmatpush3.msra.mxu1 %v672_v1  ;;  %v2482_v63 = vshrl.u32 %v779_v62, 7  ;;  %v2485_v1 = vld [vmem:[%s759_s21] sm:$0x7] }
  0xbc   : > { %1551 = vmatprep.subr.mxu0 %v2106_v4  ;;  %1586 = vmatprep.subr.mxu1 %v2106_v4 }
  0xbd   : > { %1552 = vmatpush3.msra.mxu0 %v583_v2  ;;  %1553 = vmatprep.mubr.msk.f32.mxu0 %vm2107_vm0, %v2106_v4  ;;  %v781_v0 = vsub.s32 0, %v2482_v63 }
  0xbe   : > { %1587 = vmatpush3.msra.mxu1 %v671_v3  ;;  %1588 = vmatprep.mubr.msk.f32.mxu1 %vm2107_vm0, %v2106_v4 }
  0xbf   : > { %1554 = vmatmul.mubr.f32.vlgmr.msra.gmra.mxu0 %v2324_v35  ;;  %1589 = vmatmul.mubr.f32.vlgmr.msra.gmra.mxu1 %v2324_v35  ;;  %v782_v2 = vrot.slane %v2485_v1, %v781_v0 }
  0xc0   : > { %1591 = vmatprep.subr.mxu0 %v2106_v4  ;;  %1623 = vmatprep.mubr.msk.f32.mxu0 %vm2107_vm0, %v2106_v4 }
  0xc1   : > { %1626 = vmatprep.subr.mxu1 %v2106_v4  ;;  %1658 = vmatprep.mubr.msk.f32.mxu1 %vm2107_vm0, %v2106_v4 }
  0xc2   : > { %1592 = vmatpush3.msra.mxu0 %v778_v5  ;;  %1627 = vmatpush3.msra.mxu1 %v870_v21  ;;  %v1057_v21 = vld [vmem:[#allocation13 + $0xa0] sm:$0xff] }
  0xc3   : > { %1593 = vmatprep.subr.mxu0 %v2106_v4  ;;  %1628 = vmatprep.subr.mxu1 %v2106_v4 }
  0xc4   : > { %1594 = vmatpush3.msra.mxu0 %v777_v6  ;;  %1629 = vmatpush3.msra.mxu1 %v869_v22  ;;  %v1056_v22 = vld [vmem:[#allocation13 + $0x98] sm:$0xff] }
  0xc5   : > { %1595 = vmatprep.subr.mxu0 %v2106_v4  ;;  %1630 = vmatprep.subr.mxu1 %v2106_v4 }
  0xc6   : > { %1596 = vmatpush3.msra.mxu0 %v776_v7  ;;  %1631 = vmatpush3.msra.mxu1 %v868_v23  ;;  %v1055_v23 = vld [vmem:[#allocation13 + $0x90] sm:$0xff] }
  0xc7   : > { %1597 = vmatprep.subr.mxu0 %v2106_v4  ;;  %1632 = vmatprep.subr.mxu1 %v2106_v4 }
  0xc8   : > { %1598 = vmatpush3.msra.mxu0 %v775_v8  ;;  %1633 = vmatpush3.msra.mxu1 %v867_v24  ;;  %v949_v8 = vld [vmem:[%s2453_s18 + $0x10] sm:$0xff] }
  0xc9   : > { %1599 = vmatprep.subr.mxu0 %v2106_v4  ;;  %1634 = vmatprep.subr.mxu1 %v2106_v4  ;;  %v1054_v24 = vld [vmem:[#allocation13 + $0x88] sm:$0xff] }
  0xca   : > { %1600 = vmatpush3.msra.mxu0 %v774_v9  ;;  %1635 = vmatpush3.msra.mxu1 %v866_v25  ;;  %v948_v9 = vld [vmem:[%s2453_s18 + $0x8] sm:$0xff] }
  0xcb   : > { %1601 = vmatprep.subr.mxu0 %v2106_v4  ;;  %1636 = vmatprep.subr.mxu1 %v2106_v4  ;;  %v1053_v25 = vld [vmem:[#allocation13 + $0x80] sm:$0xff] }
  0xcc   : > { %1602 = vmatpush3.msra.mxu0 %v773_v10  ;;  %1637 = vmatpush3.msra.mxu1 %v865_v26  ;;  %v947_v10 = vld [vmem:[%s2453_s18] sm:$0xff] }
  0xcd   : > { %1603 = vmatprep.subr.mxu0 %v2106_v4  ;;  %1638 = vmatprep.subr.mxu1 %v2106_v4  ;;  %v1052_v26 = vld [vmem:[#allocation13 + $0x78] sm:$0xff] }
  0xce   : > { %1604 = vmatpush3.msra.mxu0 %v772_v11  ;;  %1639 = vmatpush3.msra.mxu1 %v864_v27  ;;  %v1068_v11 = vld [vmem:[#allocation13 + $0xf8] sm:$0xff]  ;;  %v1051_v27 = vld [vmem:[#allocation13 + $0x70] sm:$0xff] }
  0xcf   : > { %1605 = vmatprep.subr.mxu0 %v2106_v4  ;;  %1640 = vmatprep.subr.mxu1 %v2106_v4 }
  0xd0   : > { %1606 = vmatpush3.msra.mxu0 %v771_v12  ;;  %1641 = vmatpush3.msra.mxu1 %v863_v28  ;;  %v1067_v12 = vld [vmem:[#allocation13 + $0xf0] sm:$0xff]  ;;  %v1050_v28 = vld [vmem:[#allocation13 + $0x68] sm:$0xff] }
  0xd1   : > { %1607 = vmatprep.subr.mxu0 %v2106_v4  ;;  %1642 = vmatprep.subr.mxu1 %v2106_v4 }
  0xd2   : > { %1608 = vmatpush3.msra.mxu0 %v770_v13  ;;  %1643 = vmatpush3.msra.mxu1 %v862_v29  ;;  %v1066_v13 = vld [vmem:[#allocation13 + $0xe8] sm:$0xff]  ;;  %v1049_v29 = vld [vmem:[#allocation13 + $0x60] sm:$0xff] }
  0xd3   : > { %1609 = vmatprep.subr.mxu0 %v2106_v4  ;;  %1644 = vmatprep.subr.mxu1 %v2106_v4 }
  0xd4   : > { %1610 = vmatpush3.msra.mxu0 %v769_v14  ;;  %1645 = vmatpush3.msra.mxu1 %v861_v30  ;;  %v1065_v14 = vld [vmem:[#allocation13 + $0xe0] sm:$0xff]  ;;  %v1048_v30 = vld [vmem:[#allocation13 + $0x58] sm:$0xff] }
  0xd5   : > { %1611 = vmatprep.subr.mxu0 %v2106_v4  ;;  %1646 = vmatprep.subr.mxu1 %v2106_v4 }
  0xd6   : > { %1612 = vmatpush3.msra.mxu0 %v768_v15  ;;  %1647 = vmatpush3.msra.mxu1 %v860_v31  ;;  %v1064_v15 = vld [vmem:[#allocation13 + $0xd8] sm:$0xff]  ;;  %v1047_v31 = vld [vmem:[#allocation13 + $0x50] sm:$0xff] }
  0xd7   : > { %1613 = vmatprep.subr.mxu0 %v2106_v4  ;;  %1648 = vmatprep.subr.mxu1 %v2106_v4 }
  0xd8   : > { %1614 = vmatpush3.msra.mxu0 %v767_v16  ;;  %1649 = vmatpush3.msra.mxu1 %v859_v32  ;;  %v1063_v16 = vld [vmem:[#allocation13 + $0xd0] sm:$0xff]  ;;  %v1046_v32 = vld [vmem:[#allocation13 + $0x48] sm:$0xff] }
  0xd9   : > { %1615 = vmatprep.subr.mxu0 %v2106_v4  ;;  %1650 = vmatprep.subr.mxu1 %v2106_v4 }
  0xda   : > { %1616 = vmatpush3.msra.mxu0 %v766_v17  ;;  %1651 = vmatpush3.msra.mxu1 %v858_v33  ;;  %v1062_v17 = vld [vmem:[#allocation13 + $0xc8] sm:$0xff]  ;;  %v1045_v33 = vld [vmem:[#allocation13 + $0x40] sm:$0xff] }
  0xdb   : > { %1617 = vmatprep.subr.mxu0 %v2106_v4  ;;  %1652 = vmatprep.subr.mxu1 %v2106_v4 }
  0xdc   : > { %1618 = vmatpush3.msra.mxu0 %v765_v18  ;;  %1653 = vmatpush3.msra.mxu1 %v857_v46  ;;  %v1061_v18 = vld [vmem:[#allocation13 + $0xc0] sm:$0xff]  ;;  %v1039_v46 = vld [vmem:[#allocation13 + $0x10] sm:$0xff] }
  0xdd   : > { %1619 = vmatprep.subr.mxu0 %v2106_v4  ;;  %1654 = vmatprep.subr.mxu1 %v2106_v4 }
  0xde   : > { %1620 = vmatpush3.msra.mxu0 %v764_v19  ;;  %1655 = vmatpush3.msra.mxu1 %v856_v47  ;;  %v1060_v19 = vld [vmem:[#allocation13 + $0xb8] sm:$0xff]  ;;  %v1038_v47 = vld [vmem:[#allocation13 + $0x8] sm:$0xff] }
  0xdf   : > { %1621 = vmatprep.subr.mxu0 %v2106_v4  ;;  %1656 = vmatprep.subr.mxu1 %v2106_v4 }
  0xe0   : > { %1622 = vmatpush3.msra.mxu0 %v763_v20  ;;  %1657 = vmatpush3.msra.mxu1 %v855_v48  ;;  %v1059_v20 = vld [vmem:[#allocation13 + $0xb0] sm:$0xff]  ;;  %v1037_v48 = vld [vmem:[#allocation13] sm:$0xff] }
  0xe1   : > { %1661 = vmatprep.subr.mxu0 %v2106_v4  ;;  %1069 = vmatprep.subr.mxu1 %v1068_v11 }
 0x15c   : > { %v490_v34 = vpop.f32.mrf.mxu0 }
 0x15e   : > { %v577_v36 = vpop.f32.mrf.mxu1  ;;  %v1485_v37 = vpop.f32.mrf.mxu0 }
 0x15f   : > { %v581_v39 = vmax.f32 %v490_v34, %v577_v36  ;;  %v1044_v34 = vld [vmem:[#allocation13 + $0x38] sm:$0xff]  ;;  %v1043_v36 = vld [vmem:[#allocation13 + $0x30] sm:$0xff]  ;;  %v1042_v37 = vld [vmem:[#allocation13 + $0x28] sm:$0xff] }
 0x160   : > { %v1520_v38 = vpop.f32.mrf.mxu1 }
 0x161   : > { %v1041_v38 = vld [vmem:[#allocation13 + $0x20] sm:$0xff] }
 0x17f   : > { %v665_v40 = vpop.f32.mrf.mxu0  ;;  %v753_v41 = vpop.f32.mrf.mxu1 }
 0x180   : > { %v669_v42 = vmax.f32 %v581_v39, %v665_v40  ;;  %v1040_v39 = vld [vmem:[#allocation13 + $0x18] sm:$0xff]  ;;  %v873_v40 = vsub.s32 1, %v2482_v63 }
 0x181   : > { %v1555_v43 = vpop.f32.mrf.mxu0  ;;  %v1590_v44 = vpop.f32.mrf.mxu1 }
 0x182   : > { %v757_v45 = vmax.f32 %v669_v42, %v753_v41  ;;  %v874_v41 = vrot.slane %v2485_v1, %v873_v40 }
 0x184   : > { %1624 = vmatmul.mubr.f32.vlgmr.msra.gmra.mxu0 %v757_v45 }
 0x185   : > { %1693 = vmatprep.mubr.msk.f32.mxu0 %vm2107_vm0, %v2106_v4  ;;  %1662 = vmatpush3.msra.mxu0 %v962_v49  ;;  %v965_v49 = vsub.s32 2, %v2482_v63 }
 0x186   : > { %1663 = vmatprep.subr.mxu0 %v2106_v4 }
 0x187   : > { %1664 = vmatpush3.msra.mxu0 %v961_v50  ;;  %v966_v50 = vrot.slane %v2485_v1, %v965_v49 }
 0x188   : > { %1665 = vmatprep.subr.mxu0 %v2106_v4 }
 0x189   : > { %1666 = vmatpush3.msra.mxu0 %v960_v51 }
 0x18a   : > { %1667 = vmatprep.subr.mxu0 %v2106_v4 }
 0x18b   : > { %1668 = vmatpush3.msra.mxu0 %v959_v52 }
 0x18c   : > { %1669 = vmatprep.subr.mxu0 %v2106_v4 }
 0x18d   : > { %1670 = vmatpush3.msra.mxu0 %v958_v53 }
 0x18e   : > { %1671 = vmatprep.subr.mxu0 %v2106_v4 }
 0x18f   : > { %1672 = vmatpush3.msra.mxu0 %v957_v54 }
 0x190   : > { %1673 = vmatprep.subr.mxu0 %v2106_v4 }
 0x191   : > { %1674 = vmatpush3.msra.mxu0 %v956_v55  ;;  %v1142_v55 = vld [vmem:[#allocation3] sm:$0xff] }
 0x192   : > { %1675 = vmatprep.subr.mxu0 %v2106_v4 }
 0x193   : > { %1676 = vmatpush3.msra.mxu0 %v955_v56 }
 0x194   : > { %1677 = vmatprep.subr.mxu0 %v2106_v4 }
 0x195   : > { %1678 = vmatpush3.msra.mxu0 %v954_v57 }
 0x196   : > { %1679 = vmatprep.subr.mxu0 %v2106_v4 }
 0x197   : > { %1680 = vmatpush3.msra.mxu0 %v953_v58 }
 0x198   : > { %1681 = vmatprep.subr.mxu0 %v2106_v4 }
 0x199   : > { %1682 = vmatpush3.msra.mxu0 %v952_v59 }
 0x19a   : > { %1683 = vmatprep.subr.mxu0 %v2106_v4 }
 0x19b   : > { %1684 = vmatpush3.msra.mxu0 %v951_v60 }
 0x19c   : > { %1685 = vmatprep.subr.mxu0 %v2106_v4 }
 0x19d   : > { %1686 = vmatpush3.msra.mxu0 %v950_v61 }
 0x19e   : > { %1687 = vmatprep.subr.mxu0 %v2106_v4 }
 0x19f   : > { %1688 = vmatpush3.msra.mxu0 %v949_v8 }
 0x1a0   : > { %1689 = vmatprep.subr.mxu0 %v2106_v4 }
 0x1a1   : > { %1690 = vmatpush3.msra.mxu0 %v948_v9 }
 0x1a2   : > { %1691 = vmatprep.subr.mxu0 %v2106_v4 }
 0x1a3   : > { %1692 = vmatpush3.msra.mxu0 %v947_v10 }
 0x244   : > { %v849_v3 = vpop.f32.mrf.mxu0 }
 0x245   : > { %v850_v5 = vadd.f32 %v849_v3, %v782_v2 }
 0x246   : > { %v1625_v6 = vpop.f32.mrf.mxu0 }
 0x247   : > { %v853_v7 = vmax.f32 %v850_v5, 0.0 }
 0x249   : > { %1659 = vmatmul.mubr.f32.vlgmr.msra.gmra.mxu1 %v853_v7 }
 0x24a   : > { %1133 = vmatprep.mubr.f32.mxu1 %v2106_v4  ;;  %1070 = vmatpush1.msra.mxu1 %v1067_v12  ;;  %v1058_v4 = vld [vmem:[#allocation13 + $0xa8] sm:$0xff] }
 0x24b   : > { %1071 = vmatprep.subr.mxu1 %v1066_v13 }
 0x24c   : > { %1072 = vmatpush1.msra.mxu1 %v1065_v14 }
 0x24d   : > { %1073 = vmatprep.subr.mxu1 %v1064_v15 }
 0x24e   : > { %1074 = vmatpush1.msra.mxu1 %v1063_v16 }
 0x24f   : > { %1075 = vmatprep.subr.mxu1 %v1062_v17 }
 0x250   : > { %1076 = vmatpush1.msra.mxu1 %v1061_v18 }
 0x251   : > { %1077 = vmatprep.subr.mxu1 %v1060_v19 }
 0x252   : > { %1078 = vmatpush1.msra.mxu1 %v1059_v20 }
 0x253   : > { %1079 = vmatprep.subr.mxu1 %v1058_v4 }
 0x254   : > { %1080 = vmatpush1.msra.mxu1 %v1057_v21 }
 0x255   : > { %1081 = vmatprep.subr.mxu1 %v1056_v22 }
 0x256   : > { %1082 = vmatpush1.msra.mxu1 %v1055_v23 }
 0x257   : > { %1083 = vmatprep.subr.mxu1 %v1054_v24 }
 0x258   : > { %1084 = vmatpush1.msra.mxu1 %v1053_v25 }
 0x259   : > { %1085 = vmatprep.subr.mxu1 %v1052_v26 }
 0x25a   : > { %1086 = vmatpush1.msra.mxu1 %v1051_v27 }
 0x25b   : > { %1087 = vmatprep.subr.mxu1 %v1050_v28 }
 0x25c   : > { %1088 = vmatpush1.msra.mxu1 %v1049_v29 }
 0x25d   : > { %1089 = vmatprep.subr.mxu1 %v1048_v30 }
 0x25e   : > { %1090 = vmatpush1.msra.mxu1 %v1047_v31 }
 0x25f   : > { %1091 = vmatprep.subr.mxu1 %v1046_v32 }
 0x260   : > { %1092 = vmatpush1.msra.mxu1 %v1045_v33 }
 0x261   : > { %1093 = vmatprep.subr.mxu1 %v1044_v34 }
 0x262   : > { %1094 = vmatpush1.msra.mxu1 %v1043_v36 }
 0x263   : > { %1095 = vmatprep.subr.mxu1 %v1042_v37 }
 0x264   : > { %1096 = vmatpush1.msra.mxu1 %v1041_v38 }
 0x265   : > { %1097 = vmatprep.subr.mxu1 %v1040_v39 }
 0x266   : > { %1098 = vmatpush1.msra.mxu1 %v1039_v46 }
 0x267   : > { %1099 = vmatprep.subr.mxu1 %v1038_v47 }
 0x268   : > { %1100 = vmatpush1.msra.mxu1 %v1037_v48 }
 0x309   : > { %v941_v42 = vpop.f32.mrf.mxu1 }
 0x30a   : > { %v942_v43 = vadd.f32 %v941_v42, %v874_v41 }
 0x30b   : > { %v1660_v44 = vpop.f32.mrf.mxu1 }
 0x30c   : > { %v945_v45 = vmax.f32 %v942_v43, 0.0 }
 0x30e   : > { %1694 = vmatmul.mubr.f32.vlgmr.msra.gmra.mxu0 %v945_v45 }
 0x3ce   : > { %v1033_v51 = vpop.f32.mrf.mxu0 }
 0x3cf   : > { %v1034_v52 = vadd.f32 %v1033_v51, %v966_v50 }
 0x3d0   : > { %v1695_v53 = vpop.f32.mrf.mxu0 }
 0x3d1   : > { %1134 = vmatmul.mubr.f32.vlgmr.msra.gmra.mxu1 %v1034_v52 }
 0x491   : > { %v1135_v54 = vpop.f32.mrf.mxu1 }
 0x492   : > { %v1140_v56 = vsub.f32 %v2324_v35, %v1135_v54  ;;  %1148 = sbr.rel (%p1325_p2) target bundleno = 1183 (0x49f), region = 84 }
 0x493   : > { %v1137_v57 = vpop.f32.mrf.mxu1 }
 0x494   : > { %1141 = vst [vmem:[#allocation2] sm:$0xff] %v1140_v56  ;;  %v1143_v58 = vadd.f32 %v1142_v55, %v1137_v57 }
 0x496   : > { %1144 = vst [vmem:[#allocation3] sm:$0xff] %v1143_v58 }
 0x49b   : > { %v1149_v59 = vld [vmem:[#allocation2] sm:$0xff] }
 0x49c   : > { %1150 = vst [vmem:[#allocation16] sm:$0xff] %v1149_v59 }
 0x49d   : > { %v1151_v60 = vld [vmem:[#allocation3] sm:$0xff] }
 0x49e   : > { %1152 = vst [vmem:[#allocation17] sm:$0xff] %v1151_v60 }
 0x49f PF: > { %p2502_p5 = scmp.eq.s32.totalorder %s1305_s10, 2  ;;  %s2108_s23 = smov [#allocation16]  }
 0x4a0   : > { %s1162_s24 = sshll.u32 %s2108_s23, 4  ;;  %s2109_s17 = smov [#allocation17]   ;;  %s1163_s24 = int_to_ptr.vmem [resolvable:$true] %s1162_s24 }
 0x4a1   : > { %s1175_s25 = sshll.u32 %s2109_s17, 4  ;;  %s1996_s27 = scalar_lea.vmem %s1163_s24, 128  ;;  %s1176_s25 = int_to_ptr.vmem [resolvable:$true] %s1175_s25 }
 0x4a2   : > { %p1997_p6 = scmp.ne.s32.totalorder %s1163_s24, %s1996_s27  ;;  %p2003_p9 = scmp.lt.s32.totalorder %s1163_s24, %s1163_s24 }
 0x4a3   : > { %p2004_p10 = scmp.lt.s32.totalorder %s1996_s27, %s1996_s27 }
 0x4a4   : > { %p1998_p7 = pnand %p1997_p6, %p2502_p5 }
 0x4a5   : > { %p2005_p11 = por %p2004_p10, %p2003_p9 }
 0x4a6   : > { %p1999_p8 = pneg %p1998_p7 }
 0x4a8   : > { %p2006_p12 = pnand %p2005_p11, %p1999_p8 }
 0x4aa   : > { %2009 = shalt.err (!%p2006_p12)
}
 0x4ab   : > { %1725 = dma.vmem_to_hbm [thread:$0]  (%p2502_p5), %s1163_s24, 128, %s2544_s7, [#allocation6]  }
 0x4ac   : > { %s2020_s30 = scalar_lea.vmem %s1176_s25, 128  ;;  %p2027_p4 = scmp.lt.s32.totalorder %s1176_s25, %s1176_s25 }
 0x4ad   : > { %p2021_p13 = scmp.ne.s32.totalorder %s1176_s25, %s2020_s30  ;;  %p2028_p3 = scmp.lt.s32.totalorder %s2020_s30, %s2020_s30 }
 0x4af   : > { %p2022_p0 = pnand %p2021_p13, %p2502_p5  ;;  %p2029_p2 = por %p2028_p3, %p2027_p4 }
 0x4b1   : > { %p2023_p1 = pneg %p2022_p0 }
 0x4b3   : > { %p2030_p6 = pnand %p2029_p2, %p2023_p1 }
 0x4b5   : > { %2033 = shalt.err (!%p2030_p6)
}
 0x4b6   : > { %1727 = dma.vmem_to_hbm [thread:$0]  (%p2502_p5), %s1176_s25, 128, %s2545_s8, [#allocation18]  }
 0x4b7   : > { %2073 = dma.done.wait (%p2502_p5), [#allocation6], 128  }
 0x4b8   : > { %2075 = vsyncadd (%p2502_p5), [#allocation6], 4294967168 }
 0x4b9   : > { %2077 = dma.done.wait (%p2502_p5), [#allocation18], 128  }
 0x4ba   : > { %2079 = vsyncadd (%p2502_p5), [#allocation18], 4294967168 }
 0x4bb PF: > { %s25_s29 = sadd.s32 1, %s2090_s29   ;;  %s2551_s27 = smov %s2086_s28 }
 0x4bc   : > { %p22_p7 = scmp.ge.s32.totalorder %s25_s29, 5   ;;  %s2552_s28 = smov %s2554_s19 }
 0x4be   :  { %24 = sbr.rel (!%p22_p7) target bundleno = 7 (0x7), region = 127 }
 0x4c3   :  { %1192 = vsyncpa [#allocation5], 1 }
 0x4c4   :  { %1194 = vsyncpa [#allocation5 + $0x1], 1 }
 0x4c5   :  { %1195 = vsyncpa [#allocation8], 1 }
 0x4c6   :  { %1196 = vsyncpa [#allocation11], 1 }
 0x4c7   :  { %1197 = vsyncpa [#allocation14], 1 }
 0x4c8   :  { %1198 = vsyncpa [#allocation6], 1 }
 0x4c9   :  { %1200 = vsyncpa [#allocation6 + $0x1], 1 }
 0x4ca   :  { %1201 = vsyncpa [#allocation18], 1 }

</bundles_post_ra>
